<compile_context>
chip_gen: v6e
topology: v6e:2x2x1
jax: 0.10.0
libtpu: 0.0.40
codegen_flags: <defaults>
</compile_context>

<pallas_src>
import functools

import jax
import jax.numpy as jnp
from jax.experimental import pallas as pl
from jax.experimental.pallas import tpu as pltpu

_EPS = 1e-5


def _round_up(x, m):
    return ((x + m - 1) // m) * m


def _vmem_capacity_bytes():
    # Generation-aware budget (v5e/v6e: 128 MiB, v7x: 64 MiB per TensorCore).
    try:
        return int(pltpu.get_tpu_info().vmem_capacity_bytes)
    except Exception:
        return 64 * 1024 * 1024  # conservative fallback (v7x-sized)


def _attn_adain_cos_kernel(
    content_ref,   # (1, C,  TQ)   raw content tile (f32)
    ckey_ref,      # (1, Ck, TQ)   content_key tile (dot dtype)
    ghat_ref,      # (1, Ck, Nsp)  G * 1/(||G||+eps), padded cols zero (dot dtype)
    h_ref,         # (1, C,  Nsp)  H = h(style) (dot dtype)
    h2_ref,        # (1, C,  Nsp)  H*H (dot dtype)
    cstat_ref,     # (1, C, 2)     [:, 0] = content mean, [:, 1] = 1/std (f32)
    wf_ref,        # (Ck, Ck)      f projection weight (dot dtype)
    bf_ref,        # (Ck, 1)       f projection bias (f32)
    out_ref,       # (1, C, TQ)
    *, ns_valid, approx_recip,
):
    f32 = jnp.float32

    # F projection of the content-key tile: (Ck, TQ), f32 accumulation.
    F = jnp.dot(wf_ref[...], ckey_ref[0], preferred_element_type=f32) + bf_ref[...]
    f_norm = jnp.sqrt(jnp.sum(F * F, axis=0, keepdims=True))              # (1, TQ)
    inv_f = pl.reciprocal(f_norm + _EPS, approx=approx_recip)             # (1, TQ)

    # A[s, q] = <G_hat[:, s], F[:, q]> -> (Nsp, TQ). Channel axis contracted directly:
    # MXU-native, no per-tile transpose, and invg is already folded into G_hat.
    A = jax.lax.dot_general(ghat_ref[0], F.astype(ghat_ref.dtype),
                            (((0,), (0,)), ((), ())),
                            preferred_element_type=f32)

    nsp = ghat_ref.shape[2]
    row = jax.lax.broadcasted_iota(jnp.int32, (nsp, 1), 0)
    maskcol = (row < ns_valid).astype(f32)                                # (Nsp, 1)

    # cosine-sim attention: relu(cos + 1) for valid style rows, exactly 0 for padding
    # (padded G_hat columns are zero and mask is zero), then normalize over style axis.
    S = jnp.maximum(A * inv_f + maskcol, 0.0)                             # (Nsp, TQ)
    denom = jnp.sum(S, axis=0, keepdims=True) + _EPS                      # (1, TQ)
    S = S * pl.reciprocal(denom, approx=approx_recip)
    Sd = S.astype(h_ref.dtype)

    # attention-weighted first/second moments: canonical (C, Nsp) @ (Nsp, TQ) matmuls.
    meanT = jax.lax.dot_general(h_ref[0], Sd, (((1,), (0,)), ((), ())),
                                preferred_element_type=f32)               # (C, TQ)
    secondT = jax.lax.dot_general(h2_ref[0], Sd, (((1,), (0,)), ((), ())),
                                  preferred_element_type=f32)             # (C, TQ)
    stdT = jnp.sqrt(jnp.maximum(secondT - meanT * meanT, 0.0))

    stats = cstat_ref[0]                                                  # (C, 2)
    normed = (content_ref[0] - stats[:, 0:1]) * stats[:, 1:2]             # (C, TQ)
    out_ref[0] = (stdT * normed + meanT).astype(out_ref.dtype)


def attn_adain_cos(content, style, content_key, style_key, params, *,
                   tq=None, dot_dtype=None, approx_recip=False):
    """content/content_key: (B, C/Ck, H, W); style/style_key: (B, C/Ck, Hs, Ws).

    dot_dtype: MXU operand dtype (default f32 = exact PyTorch semantics; use
               jnp.bfloat16 for production throughput, f32 accumulation is kept).
    approx_recip: route the small per-row/per-column reciprocals to the EUP approx path.
    """
    b, C, h, w = content.shape
    _, Ck, hs, ws = style_key.shape
    Nc, Ns = h * w, hs * ws

    wf, bf, wg, bg, wh, bh = params
    if dot_dtype is None:
        dot_dtype = jnp.float32

    content_f = content.reshape(b, C, Nc).astype(jnp.float32)
    ckey_f = content_key.reshape(b, Ck, Nc).astype(jnp.float32)
    style_f = style.reshape(b, C, Ns).astype(jnp.float32)
    skey_f = style_key.reshape(b, Ck, Ns).astype(jnp.float32)

    # ---- per-batch style-side projections hoisted out of the kernel (XLA) ----
    G = jnp.einsum("oi,bin->bon", wg.astype(jnp.float32), skey_f) + bg[None]
    Hh = jnp.einsum("oi,bin->bon", wh.astype(jnp.float32), style_f) + bh[None]
    g_norm = jnp.sqrt(jnp.sum(G * G, axis=1, keepdims=True))              # (b, 1, Ns)
    ghat = G * (1.0 / (g_norm + _EPS))                                    # invg folded in
    h2 = Hh * Hh

    # Instance-norm statistics of content (unbiased var, torch default); NaN if Nc == 1.
    c_mean = jnp.mean(content_f, axis=2, keepdims=True)                   # (b, C, 1)
    c_var = jnp.var(content_f, axis=2, ddof=1, keepdims=True) + _EPS
    c_rstd = jax.lax.rsqrt(c_var)
    cstat = jnp.concatenate([c_mean, c_rstd], axis=2)                     # (b, C, 2)

    # ---- lane-dense padding & generation-aware tiling ----
    vmem_cap = _vmem_capacity_bytes()
    vmem_limit = min(vmem_cap * 3 // 4, 100 * 1024 * 1024)
    if tq is None:
        tq = 512                                 # fits v7x after the hoist; sweep on v5e/v6e
    TQ = min(tq, _round_up(Nc, 128))
    Ncp = _round_up(Nc, TQ)
    Nsp = _round_up(Ns, 128)

    def pad_last(x, n):
        p = n - x.shape[-1]
        return x if p == 0 else jnp.pad(x, ((0, 0), (0, 0), (0, p)))

    content_p = pad_last(content_f, Ncp)
    ckey_p = pad_last(ckey_f, Ncp).astype(dot_dtype)
    ghat_p = pad_last(ghat, Nsp).astype(dot_dtype)
    h_p = pad_last(Hh, Nsp).astype(dot_dtype)
    h2_p = pad_last(h2, Nsp).astype(dot_dtype)    # keep f32 if bf16 std accuracy matters
    wf_d = wf.astype(dot_dtype)
    bf_f = bf.astype(jnp.float32)

    nq = Ncp // TQ

    flops = 2 * b * (Ck * Ck * Ncp + Ck * Ncp * Nsp + 2 * C * Ncp * Nsp)
    bytes_accessed = 4 * b * (2 * C * Ncp + Ck * Ncp + (Ck + 2 * C) * Nsp + 2 * C)
    cost = pl.CostEstimate(flops=int(flops),
                           transcendentals=int(b * (C + 3) * Ncp),
                           bytes_accessed=int(bytes_accessed))

    kernel = functools.partial(_attn_adain_cos_kernel, ns_valid=Ns,
                               approx_recip=approx_recip)

    out = pl.pallas_call(
        kernel,
        out_shape=jax.ShapeDtypeStruct((b, C, Ncp), jnp.float32),
        grid_spec=pltpu.PrefetchScalarGridSpec(
            num_scalar_prefetch=0,
            grid=(b, nq),
            in_specs=[
                pl.BlockSpec((1, C, TQ), lambda i, j: (i, 0, j)),     # content tile
                pl.BlockSpec((1, Ck, TQ), lambda i, j: (i, 0, j)),    # content_key tile
                pl.BlockSpec((1, Ck, Nsp), lambda i, j: (i, 0, 0)),   # G_hat (per batch)
                pl.BlockSpec((1, C, Nsp), lambda i, j: (i, 0, 0)),    # H     (per batch)
                pl.BlockSpec((1, C, Nsp), lambda i, j: (i, 0, 0)),    # H*H   (per batch)
                pl.BlockSpec((1, C, 2), lambda i, j: (i, 0, 0)),      # content mean/rstd
                pl.BlockSpec((Ck, Ck), lambda i, j: (0, 0)),          # wf (resident)
                pl.BlockSpec((Ck, 1), lambda i, j: (0, 0)),           # bf
            ],
            out_specs=pl.BlockSpec((1, C, TQ), lambda i, j: (i, 0, j)),
        ),
        compiler_params=pltpu.CompilerParams(
            # No scratch carry after the hoist -> both axes shard across TensorCores.
            dimension_semantics=("parallel", "parallel"),
            vmem_limit_bytes=int(vmem_limit),
        ),
        cost_estimate=cost,
    )(content_p, ckey_p, ghat_p, h_p, h2_p, cstat, wf_d, bf_f)

    return out[:, :, :Nc].reshape(b, C, h, w).astype(content.dtype)


def ref_forward(content, style, content_key, style_key, params):
    """Pure-JAX reference mirroring the PyTorch module."""
    wf, bf, wg, bg, wh, bh = params
    eps = 1e-5
    b, C, h, w = content.shape
    _, Ck, hs, ws = style_key.shape
    Nc, Ns = h * w, hs * ws

    conv1x1 = lambda x, W, bias: jnp.einsum("oi,bin->bon", W, x) + bias[None]
    F = conv1x1(content_key.reshape(b, Ck, Nc), wf, bf)
    G = conv1x1(style_key.reshape(b, Ck, Ns), wg, bg)
    H = conv1x1(style.reshape(b, C, Ns), wh, bh)

    style_flat = jnp.transpose(H, (0, 2, 1))                         # (b, Ns, C)
    G_norm = jnp.sqrt(jnp.sum(G ** 2, axis=1))[:, None, :]           # (b, 1, Ns)
    F_norm = jnp.sqrt(jnp.sum(F ** 2, axis=1))[:, :, None]           # (b, Nc, 1)
    Ft = jnp.transpose(F, (0, 2, 1))                                 # (b, Nc, Ck)
    S = jax.nn.relu(jnp.einsum("bnc,bcm->bnm", Ft, G) / (F_norm + eps) / (G_norm + eps) + 1)
    S = S / (jnp.sum(S, axis=-1, keepdims=True) + eps)
    mean = jnp.einsum("bnm,bmc->bnc", S, style_flat)
    std = jnp.sqrt(jax.nn.relu(jnp.einsum("bnm,bmc->bnc", S, style_flat ** 2) - mean ** 2))
    mean = jnp.transpose(mean.reshape(b, h, w, C), (0, 3, 1, 2))
    std = jnp.transpose(std.reshape(b, h, w, C), (0, 3, 1, 2))

    flat = content.reshape(b, C, Nc)
    c_mean = jnp.mean(flat, axis=2).reshape(b, C, 1, 1)
    c_var = jnp.var(flat, axis=2, ddof=1) + eps
    c_std = jnp.sqrt(c_var).reshape(b, C, 1, 1)
    normed = (content - c_mean) / c_std
    return std * normed + mean


if __name__ == "__main__":
    key = jax.random.PRNGKey(0)
    B, C_in, Ck = 2, 4, 4          # key_planes defaults to in_planes
    H_c, W_c = 16, 16              # content spatial
    H_s, W_s = 8, 8                # style spatial

    ks = jax.random.split(key, 10)
    content = jax.random.normal(ks[0], (B, C_in, H_c, W_c), jnp.float32)
    style = jax.random.normal(ks[1], (B, C_in, H_s, W_s), jnp.float32)
    content_key = jax.random.normal(ks[2], (B, Ck, H_c, W_c), jnp.float32)
    style_key = jax.random.normal(ks[3], (B, Ck, H_s, W_s), jnp.float32)

    # Deterministic parameter init (conv 1x1 weights squeezed to (out, in), bias (out, 1))
    scale = 0.2
    wf = scale * jax.random.normal(ks[4], (Ck, Ck), jnp.float32)
    bf = scale * jax.random.normal(ks[5], (Ck, 1), jnp.float32)
    wg = scale * jax.random.normal(ks[6], (Ck, Ck), jnp.float32)
    bg = scale * jax.random.normal(ks[7], (Ck, 1), jnp.float32)
    wh = scale * jax.random.normal(ks[8], (C_in, C_in), jnp.float32)
    bh = scale * jax.random.normal(ks[9], (C_in, 1), jnp.float32)
    params = (wf, bf, wg, bg, wh, bh)

    # f32 dots / exact reciprocals here to match the f32 PyTorch semantics at tight
    # tolerance; production: dot_dtype=jnp.bfloat16, approx_recip=True.
    out = attn_adain_cos(content, style, content_key, style_key, params)
    out = jax.block_until_ready(out)

    ref = jax.block_until_ready(ref_forward(content, style, content_key, style_key, params))
    assert out.shape == (B, C_in, H_c, W_c)
    err = float(jnp.max(jnp.abs(out - ref)))
    assert jnp.allclose(out, ref, atol=2e-4, rtol=2e-4), err

    print("KERNEL_OK")
</pallas_src>

<mosaic_0001>
module attributes {stable_mosaic.version = 11 : i64} {
  func.func @_attn_adain_cos_kernel(%arg0: i32, %arg1: i32, %arg2: memref<1x4x256xf32, #tpu.memory_space<vmem>>, %arg3: memref<1x4x256xf32, #tpu.memory_space<vmem>>, %arg4: memref<1x4x128xf32, #tpu.memory_space<vmem>>, %arg5: memref<1x4x128xf32, #tpu.memory_space<vmem>>, %arg6: memref<1x4x128xf32, #tpu.memory_space<vmem>>, %arg7: memref<1x4x2xf32, #tpu.memory_space<vmem>>, %arg8: memref<4x4xf32, #tpu.memory_space<vmem>>, %arg9: memref<4x1xf32, #tpu.memory_space<vmem>>, %arg10: memref<1x4x256xf32, #tpu.memory_space<vmem>>) attributes {dimension_semantics = [#tpu.dimension_semantics<parallel>, #tpu.dimension_semantics<parallel>], iteration_bounds = array<i64: 2, 1>, scalar_prefetch = 0 : i64, scratch_operands = 0 : i64, tpu.core_type = #tpu.core_type<tc>, window_params = [{transform_indices = @transform_0, window_bounds = array<i64: 1, 4, 256>}, {transform_indices = @transform_1, window_bounds = array<i64: 1, 4, 256>}, {transform_indices = @transform_2, window_bounds = array<i64: 1, 4, 128>}, {transform_indices = @transform_3, window_bounds = array<i64: 1, 4, 128>}, {transform_indices = @transform_4, window_bounds = array<i64: 1, 4, 128>}, {transform_indices = @transform_5, window_bounds = array<i64: 1, 4, 2>}, {pipeline_mode = #tpu.pipeline_mode<synchronous>, transform_indices = @transform_6, window_bounds = array<i64: 4, 4>}, {pipeline_mode = #tpu.pipeline_mode<synchronous>, transform_indices = @transform_7, window_bounds = array<i64: 4, 1>}, {transform_indices = @transform_8, window_bounds = array<i64: 1, 4, 256>}]} {
    %c0 = arith.constant 0 : index
    %c0_0 = arith.constant 0 : index
    %0 = vector.load %arg8[%c0, %c0_0] : memref<4x4xf32, #tpu.memory_space<vmem>>, vector<4x4xf32>
    %c0_1 = arith.constant 0 : index
    %c0_2 = arith.constant 0 : index
    %c0_3 = arith.constant 0 : index
    %1 = vector.load %arg3[%c0_1, %c0_2, %c0_3] : memref<1x4x256xf32, #tpu.memory_space<vmem>>, vector<1x4x256xf32>
    %2 = vector.shape_cast %1 : vector<1x4x256xf32> to vector<4x256xf32>
    %cst = arith.constant dense<0.000000e+00> : vector<4x256xf32>
    %3 = tpu.matmul %0, %2, %cst {dimension_numbers = #tpu.dot_dimension_numbers<[1], [0], [0], [1], [0, 0, 1, 1], [], []>} : vector<4x4xf32>, vector<4x256xf32>, vector<4x256xf32> -> vector<4x256xf32>
    %c0_4 = arith.constant 0 : index
    %c0_5 = arith.constant 0 : index
    %4 = vector.load %arg9[%c0_4, %c0_5] : memref<4x1xf32, #tpu.memory_space<vmem>>, vector<4x1xf32>
    %5 = vector.broadcast %4 : vector<4x1xf32> to vector<4x256xf32>
    %6 = arith.addf %3, %5 : vector<4x256xf32>
    %7 = arith.mulf %6, %6 : vector<4x256xf32>
    %cst_6 = arith.constant dense<0.000000e+00> : vector<256xf32>
    %8 = vector.multi_reduction <add>, %7, %cst_6 [0] : vector<4x256xf32> to vector<256xf32>
    %9 = vector.shape_cast %8 : vector<256xf32> to vector<1x256xf32>
    %10 = math.sqrt %9 : vector<1x256xf32>
    %cst_7 = arith.constant 9.99999974E-6 : f32
    %11 = vector.broadcast %cst_7 : f32 to vector<1x256xf32>
    %12 = arith.addf %10, %11 : vector<1x256xf32>
    %13 = tpu.reciprocal %12 : vector<1x256xf32> -> vector<1x256xf32>
    %c0_8 = arith.constant 0 : index
    %c0_9 = arith.constant 0 : index
    %c0_10 = arith.constant 0 : index
    %14 = vector.load %arg4[%c0_8, %c0_9, %c0_10] : memref<1x4x128xf32, #tpu.memory_space<vmem>>, vector<1x4x128xf32>
    %15 = vector.shape_cast %14 : vector<1x4x128xf32> to vector<4x128xf32>
    %cst_11 = arith.constant dense<0.000000e+00> : vector<128x256xf32>
    %16 = tpu.matmul %15, %6, %cst_11 {dimension_numbers = #tpu.dot_dimension_numbers<[0], [0], [1], [1], [0, 1, 1, 1], [], []>} : vector<4x128xf32>, vector<4x256xf32>, vector<128x256xf32> -> vector<128x256xf32>
    %17 = tpu.iota {dimensions = array<i32: 0>} : vector<128x1xi32>
    %c64_i32 = arith.constant 64 : i32
    %18 = vector.broadcast %c64_i32 : i32 to vector<128x1xi32>
    %19 = arith.cmpi slt, %17, %18 : vector<128x1xi32>
    %20 = arith.extui %19 : vector<128x1xi1> to vector<128x1xi32>
    %21 = arith.sitofp %20 : vector<128x1xi32> to vector<128x1xf32>
    %22 = vector.broadcast %13 : vector<1x256xf32> to vector<128x256xf32>
    %23 = arith.mulf %16, %22 : vector<128x256xf32>
    %24 = vector.broadcast %21 : vector<128x1xf32> to vector<128x256xf32>
    %25 = arith.addf %23, %24 : vector<128x256xf32>
    %cst_12 = arith.constant 0.000000e+00 : f32
    %26 = vector.broadcast %cst_12 : f32 to vector<128x256xf32>
    %27 = arith.maximumf %25, %26 : vector<128x256xf32>
    %cst_13 = arith.constant dense<0.000000e+00> : vector<256xf32>
    %28 = vector.multi_reduction <add>, %27, %cst_13 [0] : vector<128x256xf32> to vector<256xf32>
    %29 = vector.shape_cast %28 : vector<256xf32> to vector<1x256xf32>
    %cst_14 = arith.constant 9.99999974E-6 : f32
    %30 = vector.broadcast %cst_14 : f32 to vector<1x256xf32>
    %31 = arith.addf %29, %30 : vector<1x256xf32>
    %32 = tpu.reciprocal %31 : vector<1x256xf32> -> vector<1x256xf32>
    %33 = vector.broadcast %32 : vector<1x256xf32> to vector<128x256xf32>
    %34 = arith.mulf %27, %33 : vector<128x256xf32>
    %c0_15 = arith.constant 0 : index
    %c0_16 = arith.constant 0 : index
    %c0_17 = arith.constant 0 : index
    %35 = vector.load %arg5[%c0_15, %c0_16, %c0_17] : memref<1x4x128xf32, #tpu.memory_space<vmem>>, vector<1x4x128xf32>
    %36 = vector.shape_cast %35 : vector<1x4x128xf32> to vector<4x128xf32>
    %cst_18 = arith.constant dense<0.000000e+00> : vector<4x256xf32>
    %37 = tpu.matmul %36, %34, %cst_18 {dimension_numbers = #tpu.dot_dimension_numbers<[1], [0], [0], [1], [0, 0, 1, 1], [], []>} : vector<4x128xf32>, vector<128x256xf32>, vector<4x256xf32> -> vector<4x256xf32>
    %c0_19 = arith.constant 0 : index
    %c0_20 = arith.constant 0 : index
    %c0_21 = arith.constant 0 : index
    %38 = vector.load %arg6[%c0_19, %c0_20, %c0_21] : memref<1x4x128xf32, #tpu.memory_space<vmem>>, vector<1x4x128xf32>
    %39 = vector.shape_cast %38 : vector<1x4x128xf32> to vector<4x128xf32>
    %cst_22 = arith.constant dense<0.000000e+00> : vector<4x256xf32>
    %40 = tpu.matmul %39, %34, %cst_22 {dimension_numbers = #tpu.dot_dimension_numbers<[1], [0], [0], [1], [0, 0, 1, 1], [], []>} : vector<4x128xf32>, vector<128x256xf32>, vector<4x256xf32> -> vector<4x256xf32>
    %41 = arith.mulf %37, %37 : vector<4x256xf32>
    %42 = arith.subf %40, %41 : vector<4x256xf32>
    %cst_23 = arith.constant 0.000000e+00 : f32
    %43 = vector.broadcast %cst_23 : f32 to vector<4x256xf32>
    %44 = arith.maximumf %42, %43 : vector<4x256xf32>
    %45 = math.sqrt %44 : vector<4x256xf32>
    %c0_24 = arith.constant 0 : index
    %c0_25 = arith.constant 0 : index
    %c0_26 = arith.constant 0 : index
    %46 = vector.load %arg7[%c0_24, %c0_25, %c0_26] : memref<1x4x2xf32, #tpu.memory_space<vmem>>, vector<1x4x2xf32>
    %47 = vector.shape_cast %46 : vector<1x4x2xf32> to vector<4x2xf32>
    %c0_27 = arith.constant 0 : index
    %c0_28 = arith.constant 0 : index
    %c0_29 = arith.constant 0 : index
    %48 = vector.load %arg2[%c0_27, %c0_28, %c0_29] : memref<1x4x256xf32, #tpu.memory_space<vmem>>, vector<1x4x256xf32>
    %49 = vector.shape_cast %48 : vector<1x4x256xf32> to vector<4x256xf32>
    %50 = vector.extract_strided_slice %47 {offsets = [0, 0], sizes = [4, 1], strides = [1, 1]} : vector<4x2xf32> to vector<4x1xf32>
    %51 = vector.broadcast %50 : vector<4x1xf32> to vector<4x256xf32>
    %52 = arith.subf %49, %51 : vector<4x256xf32>
    %53 = vector.extract_strided_slice %47 {offsets = [0, 1], sizes = [4, 1], strides = [1, 1]} : vector<4x2xf32> to vector<4x1xf32>
    %54 = vector.broadcast %53 : vector<4x1xf32> to vector<4x256xf32>
    %55 = arith.mulf %52, %54 : vector<4x256xf32>
    %56 = arith.mulf %45, %55 : vector<4x256xf32>
    %57 = arith.addf %56, %37 : vector<4x256xf32>
    %c0_30 = arith.constant 0 : index
    %c0_31 = arith.constant 0 : index
    %c0_32 = arith.constant 0 : index
    %58 = vector.load %arg10[%c0_30, %c0_31, %c0_32] : memref<1x4x256xf32, #tpu.memory_space<vmem>>, vector<1x4x256xf32>
    %59 = vector.shape_cast %58 : vector<1x4x256xf32> to vector<4x256xf32>
    %60 = vector.shape_cast %57 : vector<4x256xf32> to vector<1x4x256xf32>
    tpu.vector_store %arg10[%c0_30, %c0_31, %c0_32], %60 {strides = array<i32>} : memref<1x4x256xf32, #tpu.memory_space<vmem>>, vector<1x4x256xf32>,
    return
  }
  func.func @transform_0(%arg0: i32, %arg1: i32) -> (i32, i32, i32) {
    %c0_i32 = arith.constant 0 : i32
    %c0_i32_0 = arith.constant 0 : i32
    return %arg0, %c0_i32, %arg1 : i32, i32, i32
  }
  func.func @transform_1(%arg0: i32, %arg1: i32) -> (i32, i32, i32) {
    %c0_i32 = arith.constant 0 : i32
    %c0_i32_0 = arith.constant 0 : i32
    return %arg0, %c0_i32, %arg1 : i32, i32, i32
  }
  func.func @transform_2(%arg0: i32, %arg1: i32) -> (i32, i32, i32) {
    %c0_i32 = arith.constant 0 : i32
    %c0_i32_0 = arith.constant 0 : i32
    %c0_i32_1 = arith.constant 0 : i32
    return %arg0, %c0_i32, %c0_i32_0 : i32, i32, i32
  }
  func.func @transform_3(%arg0: i32, %arg1: i32) -> (i32, i32, i32) {
    %c0_i32 = arith.constant 0 : i32
    %c0_i32_0 = arith.constant 0 : i32
    %c0_i32_1 = arith.constant 0 : i32
    return %arg0, %c0_i32, %c0_i32_0 : i32, i32, i32
  }
  func.func @transform_4(%arg0: i32, %arg1: i32) -> (i32, i32, i32) {
    %c0_i32 = arith.constant 0 : i32
    %c0_i32_0 = arith.constant 0 : i32
    %c0_i32_1 = arith.constant 0 : i32
    return %arg0, %c0_i32, %c0_i32_0 : i32, i32, i32
  }
  func.func @transform_5(%arg0: i32, %arg1: i32) -> (i32, i32, i32) {
    %c0_i32 = arith.constant 0 : i32
    %c0_i32_0 = arith.constant 0 : i32
    %c0_i32_1 = arith.constant 0 : i32
    return %arg0, %c0_i32, %c0_i32_0 : i32, i32, i32
  }
  func.func @transform_6(%arg0: i32, %arg1: i32) -> (i32, i32) {
    %c0_i32 = arith.constant 0 : i32
    %c0_i32_0 = arith.constant 0 : i32
    %c0_i32_1 = arith.constant 0 : i32
    return %c0_i32, %c0_i32_0 : i32, i32
  }
  func.func @transform_7(%arg0: i32, %arg1: i32) -> (i32, i32) {
    %c0_i32 = arith.constant 0 : i32
    %c0_i32_0 = arith.constant 0 : i32
    %c0_i32_1 = arith.constant 0 : i32
    return %c0_i32, %c0_i32_0 : i32, i32
  }
  func.func @transform_8(%arg0: i32, %arg1: i32) -> (i32, i32, i32) {
    %c0_i32 = arith.constant 0 : i32
    %c0_i32_0 = arith.constant 0 : i32
    return %arg0, %c0_i32, %arg1 : i32, i32, i32
  }
}

</mosaic_0001>

<bundles_post_ra>
// kernel: tpu_custom_call.1
= control target key start
LH: loop header
LB: loop body
LE: loop exit
PB: predicated region body
PF: predicated region fallthrough
CT: control target
= control target key end

     0   :  { %s2450_s0 = inlined_call_operand.vmem [shape: f32[2,4,256], index: 0, kind: input, shape index: {}]   ;;  %s2451_s1 = inlined_call_operand.hbm [shape: f32[2,4,256], index: 1, kind: input, shape index: {}]   ;;  %s2452_s2 = inlined_call_operand.hbm [shape: f32[2,4,128], index: 2, kind: input, shape index: {}]   ;;  %s2453_s3 = inlined_call_operand.hbm [shape: f32[2,4,128], index: 3, kind: input, shape index: {}]   ;;  %s2454_s4 = inlined_call_operand.vmem [shape: f32[2,4,128], index: 4, kind: input, shape index: {}]   ;;  %s2455_s5 = inlined_call_operand.vmem [shape: f32[2,4,2], index: 5, kind: input, shape index: {}]   ;;  %s2456_s6 = inlined_call_operand.hbm [shape: f32[4,4], index: 6, kind: input, shape index: {}]   ;;  %s2457_s7 = inlined_call_operand.vmem [shape: f32[4,1], index: 7, kind: input, shape index: {}]   ;;  %s2458_s8 = inlined_call_operand.hbm [shape: f32[2,4,256], index: 8, kind: output, shape index: {}]  }
   0x1   :  { %2484 = sst [smem:[#allocation21_spill]] %s2452_s2 }
   0x2   :  { %2485 = sst [smem:[#allocation22_spill]] %s2453_s3 }
   0x3   :  { %13 = vsyncpa [#allocation3], 0 }
   0x4   :  { %15 = vsyncpa [#allocation3 + $0x1], 0 }
   0x5   :  { %16 = vsyncpa [#allocation6], 0 }
   0x6   :  { %18 = vsyncpa [#allocation6 + $0x1], 0 }
   0x7   :  { %19 = vsyncpa [#allocation9], 0 }
   0x8   :  { %20 = vsyncpa [#allocation4], 0 }
   0x9   :  { %22 = vsyncpa [#allocation4 + $0x1], 0  ;;  %s1919_s27 = smov 0   ;;  %s1921_s28 = smov 0  }
   0xa   :  { %s1923_s29 = smov 0   ;;  %s1925_s30 = smov 0  }
   0xb   :  { %s1927_s9 = smov 0   ;;  %s1929_s10 = smov 0  }
   0xc LB: > { %2486 = sst [smem:[#allocation15_spill]] %s1851_s29  ;;  %s40_s11 = sadd.s32 1, %s1859_s9  ;;  %s1863_s10 = sphi %s1929_s10, %s28_s10   ;;  %s1859_s9 = sphi %s1927_s9, %s2528_s9   ;;  %s1855_s30 = sphi %s1925_s30, %s2527_s30   ;;  %s1851_s29 = sphi %s1923_s29, %s2526_s29   ;;  %s1847_s28 = sphi %s1921_s28, %s2530_s28   ;;  %s1843_s27 = sphi %s1919_s27, %s2529_s27  }
   0xd   : > { %2487 = sst [smem:[#allocation16_spill]] %s1859_s9  ;;  %s77_s12 = sadd.s32 1, %s1851_s29 }
   0xe   : > { %2488 = sst [smem:[#allocation17_spill]] %s1863_s10  ;;  %p42_p0 = scmp.ge.s32.totalorder %s40_s11, 2 }
   0xf   : > { %p84_p1 = scmp.ne.s32.totalorder %s1851_s29, %s1847_s28  ;;  %p85_p2 = scmp.eq.s32.totalorder %s1863_s10, 0 }
  0x10   : > { %s2532_s11 = smov (%p42_p0, %s40_s11), 0  ;;  %p1588_p5 = scmp.lt.s32.totalorder %s1863_s10, 2 }
  0x11   : > { %2489 = sst [smem:[#allocation18_spill]] %s2532_s11  ;;  %p86_p4 = por %p85_p2, %p84_p1 }
  0x12   : > { %s72_s13 = ssub.s32 %s1859_s9, %s2532_s11  ;;  %s1964_s14 = sand.u32 1, %s1851_s29  }
  0x13   : > { %p75_p6 = scmp.eq.s32.totalorder %s72_s13, 0  ;;  %p1966_p7 = pnand %p1588_p5, %p86_p4 }
  0x14   : > { %s336_s16 = sand.u32 1, %s1863_s10   ;;  %s2460_s17 = sshll.u32 %s1964_s14, 2 }
  0x15   : > { %s1973_s18 = scalar_select %p75_p6, %s1851_s29, %s77_s12  }
  0x16   : > { %s1515_s19 = sshll.u32 %s1859_s9, 6  ;;  %s2492_s2 = sld [smem:[#allocation21_spill]] }
  0x17   : > { %2491 = sst [smem:[#allocation19_spill]] %s1973_s18  ;;  %s340_s23 = scalar_lea.vmem [#allocation5], %s2460_s17 }
  0x18   : > { %s347_s24 = sshll.u32 %s340_s23, 4  ;;  %s1981_s25 = scalar_lea.sflag [#allocation6], %s336_s16  ;;  %s348_s24 = int_to_ptr.vmem [resolvable:$true] %s347_s24 }
  0x19   : > { %p2467_p8 = pneg %p1966_p7  ;;  %s1678_s26 = scalar_lea.vmem %s348_s24, 64 }
  0x1a   : > { %p1679_p9 = scmp.ne.s32.totalorder %s348_s24, %s1678_s26  ;;  %s1865_s12 = smov [#allocation5]  }
  0x1b   : > { %s1683_s13 = sshll.u32 %s1865_s12, 4  ;;  %s1684_s13 = int_to_ptr.vmem [resolvable:$false] %s1683_s13 }
  0x1c   : > { %s345_s22 = scalar_lea.hbm %s2492_s2, %s1515_s19  ;;  %p1681_p10 = pnand %p1679_p9, %p2467_p8 }
  0x1d   : > { %s1685_s11 = scalar_lea.vmem %s1684_s13, 128  ;;  %p1686_p12 = scmp.lt.s32.totalorder %s348_s24, %s1684_s13 }
  0x1e   : > { %p1682_p11 = pneg %p1681_p10  ;;  %p1687_p13 = scmp.lt.s32.totalorder %s1685_s11, %s1678_s26 }
  0x20   : > { %p1688_p0 = por %p1687_p13, %p1686_p12 }
  0x22   : > { %p1689_p2 = pnand %p1688_p0, %p1682_p11 }
  0x24   : > { %1692 = shalt.err (!%p1689_p2)
}
  0x25   : > { %1579 = dma.hbm_to_vmem [thread:$0]  (!%p1966_p7), %s345_s22, 64, %s348_s24, %s1981_s25  }
  0x26   : > { %s2493_s3 = sld [smem:[#allocation22_spill]]  ;;  %s1997_s11 = sadd.s32 4294967295, %s1863_s10  }
  0x27   : > { %s1507_s23 = sadd.s32 4294967294, %s1863_s10   ;;  %p90_p4 = scmp.ne.s32.totalorder %s1847_s28, %s1843_s27 }
  0x28   : > { %p2466_p5 = scmp.eq.s32.totalorder %s1997_s11, 0  ;;  %p262_p6 = scmp.eq.s32.totalorder %s1997_s11, 1 }
  0x29   : > { %p268_p9 = scmp.eq.s32.totalorder %s1507_s23, 1  ;;  %p1508_p10 = scmp.ge.s32.totalorder %s1863_s10, 1 }
  0x2a   : > { %p2007_p11 = por %p2466_p5, %p90_p4  ;;  %p2014_p12 = por %p262_p6, %p84_p1 }
  0x2b   : > { %p2018_p13 = por %p268_p9, %p90_p4  ;;  %p275_p0 = scmp.lt.s32.totalorder %s1863_s10, 3 }
  0x2c   : > { %s1994_s21 = scalar_lea.hbm %s2493_s3, %s1515_s19  ;;  %s1866_s12 = smov [#allocation8]  }
  0x2d   : > { %s2495_s19 = scalar_select %p2014_p12, 1, 0 }
  0x2e   : > { %s2496_s24 = scalar_select %p2018_p13, 1, 0 }
  0x2f   : > { %p2023_p2 = pnand %p1508_p10, %p275_p0  ;;  %s288_s13 = sshll.u32 %s1866_s12, 4  ;;  %s289_s13 = int_to_ptr.vmem [resolvable:$true] %s288_s13 }
  0x30   : > { %2497 = sst [smem:[#allocation20_spill]] %s2496_s24  ;;  %s1511_s16 = sshll.u32 %s1964_s14, 3 }
  0x31   : > { %p1569_p3 = pneg %p2023_p2  ;;  %s1554_s20 = sshll.u32 %s1859_s9, 7 }
  0x32   : > { %s2040_s3 = scalar_lea.hbm %s2451_s1, %s1554_s20  ;;  %s319_s18 = scalar_lea.vmem [#allocation2], %s1511_s16 }
  0x33   : > { %p2033_p1 = pnand %p1569_p3, %p2466_p5  ;;  %s329_s29 = sshll.u32 %s319_s18, 4  ;;  %s330_s29 = int_to_ptr.vmem [resolvable:$true] %s329_s29 }
  0x34   : > { %s2500_s10 = sshll.u32 %s1964_s14, 2  ;;  %s1704_s9 = scalar_lea.vmem %s289_s13, 64 }
  0x35   : > { %s2044_s12 = scalar_lea.vmem [#allocation7], %s2500_s10  ;;  %p1695_p4 = pneg %p2033_p1 }
  0x36   : > { %s365_s24 = sshll.u32 %s2044_s12, 4  ;;  %p1705_p3 = scmp.ne.s32.totalorder %s289_s13, %s1704_s9  ;;  %s366_s24 = int_to_ptr.vmem [resolvable:$true] %s365_s24 }
  0x37   : > { %p1712_p10 = scmp.lt.s32.totalorder %s289_s13, %s289_s13  ;;  %p1713_p0 = scmp.lt.s32.totalorder %s1704_s9, %s1704_s9 }
  0x38   : > { %p1707_p6 = pnand %p1705_p3, %p1695_p4 }
  0x39   : > { %p1714_p5 = por %p1713_p0, %p1712_p10 }
  0x3a   : > { %p1708_p9 = pneg %p1707_p6 }
  0x3c   : > { %p1715_p8 = pnand %p1714_p5, %p1708_p9 }
  0x3e   : > { %1718 = shalt.err (!%p1715_p8)
}
  0x3f   : > { %1572 = dma.hbm_to_vmem [thread:$0]  (!%p2033_p1), %s2456_s6, 64, %s289_s13, [#allocation9]  }
  0x40   : > { %s316_s10 = scalar_lea.sflag [#allocation3], %s1964_s14  ;;  %s1732_s18 = scalar_lea.vmem %s330_s29, 128 }
  0x41   : > { %p1733_p13 = scmp.ne.s32.totalorder %s330_s29, %s1732_s18  ;;  %p2501_p12 = pneg %p1966_p7 }
  0x42   : > { %s1867_s16 = smov [#allocation2]  }
  0x43   : > { %p1735_p4 = pnand %p1733_p13, %p2501_p12  ;;  %s1737_s9 = sshll.u32 %s1867_s16, 4  ;;  %s1738_s9 = int_to_ptr.vmem [resolvable:$false] %s1737_s9 }
  0x44   : > { %s1739_s20 = scalar_lea.vmem %s1738_s9, 256  ;;  %p1740_p8 = scmp.lt.s32.totalorder %s330_s29, %s1738_s9 }
  0x45   : > { %p1736_p3 = pneg %p1735_p4  ;;  %p1741_p5 = scmp.lt.s32.totalorder %s1739_s20, %s1732_s18 }
  0x47   : > { %p1742_p6 = por %p1741_p5, %p1740_p8 }
  0x49   : > { %p1743_p9 = pnand %p1742_p6, %p1736_p3 }
  0x4b   : > { %1746 = shalt.err (!%p1743_p9)
}
  0x4c   : > { %1576 = dma.hbm_to_vmem [thread:$0]  (!%p1966_p7), %s2040_s3, 128, %s330_s29, %s316_s10  }
  0x4d   : > { %s1760_s14 = scalar_lea.vmem %s366_s24, 64  ;;  %p2502_p13 = pneg %p1966_p7 }
  0x4e   : > { %p1761_p12 = scmp.ne.s32.totalorder %s366_s24, %s1760_s14  ;;  %s1868_s13 = smov [#allocation7]  }
  0x4f   : > { %s1765_s23 = sshll.u32 %s1868_s13, 4  ;;  %s1766_s23 = int_to_ptr.vmem [resolvable:$false] %s1765_s23 }
  0x50   : > { %p1763_p1 = pnand %p1761_p12, %p2502_p13  ;;  %s1767_s2 = scalar_lea.vmem %s1766_s23, 128 }
  0x51   : > { %p1768_p0 = scmp.lt.s32.totalorder %s366_s24, %s1766_s23  ;;  %p1769_p4 = scmp.lt.s32.totalorder %s1767_s2, %s1760_s14 }
  0x52   : > { %p1764_p10 = pneg %p1763_p1 }
  0x53   : > { %p1770_p3 = por %p1769_p4, %p1768_p0 }
  0x55   : > { %p1771_p8 = pnand %p1770_p3, %p1764_p10 }
  0x57   : > { %1774 = shalt.err (!%p1771_p8)
}
  0x58   : > { %1582 = dma.hbm_to_vmem [thread:$0]  (!%p1966_p7), %s1994_s21, 64, %s366_s24, %s1981_s25  }
  0x59   : > { %388 = sbr.rel (%p2023_p2) target bundleno = 896 (0x380), region = 52  ;;  %s2073_s3 = sand.u32 (!%p2023_p2), 1, %s1847_s28  }
  0x5a   : > { %s1519_s29 = sshll.u32 (!%p2023_p2), %s2073_s3, 3  ;;  %s391_s12 = scalar_lea.sflag (!%p2023_p2), [#allocation3], %s2073_s3 }
  0x5b   : > { %s394_s17 = scalar_lea.vmem (!%p2023_p2), [#allocation2], %s1519_s29 }
  0x5e   : > { %1826 = dma.done.wait (%p2007_p11), %s391_s12, 128  }
  0x5f   : > { %1828 = vsyncadd (%p2007_p11), %s391_s12, 4294967168  ;;  %s399_s15 = sand.u32 1, %s1997_s11   ;;  %s1520_s25 = sshll.u32 %s2073_s3, 2 }
  0x60   : > { %s400_s21 = scalar_lea.sflag [#allocation6], %s399_s15  ;;  %s403_s24 = scalar_lea.vmem [#allocation5], %s1520_s25 }
  0x61   : > { %1830 = dma.done.wait (%p2007_p11), %s400_s21, 128  }
  0x62   : > { %1832 = vsyncadd (%p2007_p11), %s400_s21, 4294967168  ;;  %s2089_s26 = scalar_lea.vmem [#allocation7], %s1520_s25  ;;  %p2503_p7 = scmp.eq.s32.totalorder %s1997_s11, 0 }
  0x64   : > { %1834 = dma.done.wait (%p2503_p7), [#allocation9], 64   ;;  %p2504_p2 = pmov %p2503_p7 }
  0x65   : > { %v2469_v0 = vmov 0.0   ;;  %v1870_v1 = vmov 0   ;;  %v497_v2 = vld [vmem:[%s394_s17] sm:$0xff]  ;;  %vm510_vm0 = vcmask 1043456   ;;  %vm506_vm1 = vcmask 31744   ;;  %p477_p11 = scmp.lt.s32.totalorder %s1855_s30, 1 }
  0x66   : > { %1836 = vsyncadd (%p2504_p2), [#allocation9], 4294967232  ;;  %579 = vmatprep.mubr.f32.mxu0 %v2469_v0  ;;  %1644 = vset.pattern.permute.xlu0 %v1870_v1  ;;  %v498_v3 = vld [vmem:[%s2457_s7] sm:$0xf]  ;;  %v505_v4 = vcombine.high %v497_v2, %v497_v2  ;;  %v620_v6 = vld [vmem:[%s403_s24] sm:$0xf] }
  0x67   : > { %771 = vmatprep.mubr.f32.mxu1 %v2469_v0  ;;  %1645 = vset.pattern.permute.xlu1 %v1870_v1  ;;  %v496_v5 = vld [vmem:[#allocation8] sm:$0xf]  ;;  %s2201_s11 = scalar_select %p477_p11, %s1855_s30, 1 }
  0x68   : > { %501 = vperm.xlu0 %1644, %v498_v3   ;;  %1528 = vmatprep.subr.msk.mxu0 %vm510_vm0, %v505_v4  ;;  %s1556_s25 = sshll.u32 %s1855_s30, 7  ;;  %s475_s21 = scalar_lea.vmem [#allocation10], %s1519_s29 }
  0x69   : > { %1529 = vmatpush1.msk.msra.mxu0 %vm510_vm0, %v497_v2  ;;  %s1526_s18 = sshll.u32 %s2201_s11, 2  ;;  %s1555_s2 = sshll.u32 %s2201_s11, 3 }
  0x6a   : > { %1530 = vmatmul.mubr.msk.f32.vlgmr.msra.gmra.mxu0 %vm506_vm1, %v496_v5  ;;  %s494_s20 = scalar_lea.vmem %s2455_s5, %s1526_s18  ;;  %s490_s23 = scalar_lea.vmem %s2454_s4, %s1526_s18 }
  0x6b   : > { %1172 = vmatprep.mubr.f32.mxu0 %v2469_v0  ;;  %s484_s15 = scalar_lea.vmem %s2450_s0, %s1555_s2  ;;  %s1327_s24 = sshll.u32 %s475_s21, 4  ;;  %s1328_s24 = int_to_ptr.vmem [resolvable:$true] %s1327_s24 }
  0x6c   : > { %s1325_s10 = scalar_lea.hbm %s2458_s8, %s1556_s25  ;;  %s1311_s11 = scalar_lea.sflag [#allocation4], %s2073_s3 }
  0x6d   : > { %s1775_s18 = scalar_lea.vmem %s1328_s24, 128  ;;  %p2520_p6 = scmp.ne.s32.totalorder %s2495_s19, 0 }
  0x6e   : > { %p1776_p5 = scmp.ne.s32.totalorder %s1328_s24, %s1775_s18  ;;  %s1873_s16 = smov [#allocation10]  }
  0x6f   : > { %s1779_s30 = sshll.u32 %s1873_s16, 4  ;;  %s1780_s30 = int_to_ptr.vmem [resolvable:$false] %s1779_s30 }
  0x70   : > { %p1777_p9 = pnand %p1776_p5, %p2520_p6  ;;  %s1781_s29 = scalar_lea.vmem %s1780_s30, 256 }
  0x71   : > { %p1782_p13 = scmp.lt.s32.totalorder %s1328_s24, %s1780_s30  ;;  %p1783_p1 = scmp.lt.s32.totalorder %s1781_s29, %s1775_s18 }
  0x72   : > { %p1778_p12 = pneg %p1777_p9 }
  0x73   : > { %p1784_p10 = por %p1783_p1, %p1782_p13 }
  0x75   : > { %p1785_p0 = pnand %p1784_p10, %p1778_p12 }
  0x86   : > { %621 = vxpose.xlu0.b32.start.end [1/1] (short) %v620_v6, 128 }
  0xe3   : > { %v502_v7 = vpop.permute.xlu0 %501 }
 0x102   : > { %v637_v8 = vpop.trf.xlu0 }
 0x106   : > { %v638_v9 = vpop.trf.xlu0 }
 0x10a   : > { %v639_v10 = vpop.trf.xlu0 }
 0x10e   : > { %v640_v11 = vpop.trf.xlu0 }
 0x112   : > { %v641_v12 = vpop.trf.xlu0 }
 0x116   : > { %v642_v17 = vpop.trf.xlu0 }
 0x11a   : > { %v643_v18 = vpop.trf.xlu0 }
 0x11e   : > { %v644_v19 = vpop.trf.xlu0 }
 0x122   : > { %v645_v20 = vpop.trf.xlu0 }
 0x126   : > { %v646_v21 = vpop.trf.xlu0 }
 0x12a   : > { %v581_v13 = vpop.f32.mrf.mxu0  ;;  %v647_v22 = vpop.trf.xlu0 }
 0x12b   : > { %v582_v16 = vadd.f32 %v581_v13, %v502_v7 }
 0x12c   : > { %v583_v14 = vpop.f32.mrf.mxu0 }
 0x12d   : > { %v584_v15 = vadd.f32 %v583_v14, %v502_v7  ;;  %v586_v28 = vmul.f32 %v582_v16, %v582_v16 }
 0x12e   : > { %v648_v23 = vpop.trf.xlu0 }
 0x12f   : > { %1531 = vmatprep.subr.msk.mxu1 %vm510_vm0, %v584_v15  ;;  %v587_v29 = vmul.f32 %v584_v15, %v584_v15  ;;  %v588_v30 = vsel %vm510_vm0, %v586_v28, 0.0 }
 0x130   : > { %1532 = vmatpush1.msk.msra.mxu1 %vm510_vm0, %v582_v16  ;;  %v589_v32 = vrot.slane %v588_v30, 4 }
 0x131   : > { %1533 = vmatmul.mubr.msk.f32.vlgmr.msra.gmra.mxu1 %vm506_vm1, %v637_v8  ;;  %v595_v31 = vsel %vm510_vm0, %v587_v29, 0.0 }
 0x132   : > { %777 = vmatprep.mubr.f32.mxu1 %v2469_v0  ;;  %v649_v24 = vpop.trf.xlu0  ;;  %v596_v33 = vrot.slane %v595_v31, 4  ;;  %v590_v34 = vadd.f32 %v589_v32, %v588_v30 }
 0x134   : > { %v597_v35 = vadd.f32 %v596_v33, %v595_v31  ;;  %v591_v36 = vrot.slane %v590_v34, 2 }
 0x135   : > { %1534 = vmatmul.mubr.msk.f32.gmra.mxu1 %vm506_vm1, %v638_v9 }
 0x136   : > { %783 = vmatprep.mubr.f32.mxu1 %v2469_v0  ;;  %v650_v25 = vpop.trf.xlu0  ;;  %v598_v37 = vrot.slane %v597_v35, 2  ;;  %v592_v38 = vadd.f32 %v591_v36, %v590_v34 }
 0x138   : > { %v599_v39 = vadd.f32 %v598_v37, %v597_v35  ;;  %v593_v40 = vrot.slane %v592_v38, 1 }
 0x139   : > { %1535 = vmatmul.mubr.msk.f32.gmra.mxu1 %vm506_vm1, %v639_v10 }
 0x13a   : > { %789 = vmatprep.mubr.f32.mxu1 %v2469_v0  ;;  %v651_v26 = vpop.trf.xlu0  ;;  %v600_v41 = vrot.slane %v599_v39, 1  ;;  %v594_v42 = vadd.f32 %v593_v40, %v592_v38 }
 0x13c   : > { %v601_v43 = vadd.f32 %v600_v41, %v599_v39  ;;  %1649 = vrsqrt.f32 %v594_v42  ;;  %vm604_vm2 = vcmp.eq.f32.partialorder %v594_v42, inf  ;;  %v607_v49 = vand.u32 2147483648, %v594_v42 }
 0x13d   : > { %1536 = vmatmul.mubr.msk.f32.gmra.mxu1 %vm506_vm1, %v640_v11  ;;  %vm606_vm4 = vcmp.eq.f32.partialorder %v594_v42, 0.0 }
 0x13e   : > { %795 = vmatprep.mubr.f32.mxu1 %v2469_v0  ;;  %v652_v27 = vpop.trf.xlu0  ;;  %1651 = vrsqrt.f32 %v601_v43  ;;  %vm611_vm3 = vcmp.eq.f32.partialorder %v601_v43, inf  ;;  %v614_v51 = vand.u32 2147483648, %v601_v43  ;;  %vm613_vm5 = vcmp.eq.f32.partialorder %v601_v43, 0.0 }
 0x141   : > { %1537 = vmatmul.mubr.msk.f32.gmra.mxu1 %vm506_vm1, %v641_v12 }
 0x142   : > { %801 = vmatprep.mubr.f32.mxu1 %v2469_v0 }
 0x145   : > { %1538 = vmatmul.mubr.msk.f32.gmra.mxu1 %vm506_vm1, %v642_v17 }
 0x146   : > { %807 = vmatprep.mubr.f32.mxu1 %v2469_v0 }
 0x149   : > { %1539 = vmatmul.mubr.msk.f32.gmra.mxu1 %vm506_vm1, %v643_v18  ;;  %v1650_v44 = vpop.eup %1649 }
 0x14a   : > { %813 = vmatprep.mubr.f32.mxu1 %v2469_v0  ;;  %v603_v46 = vmul.f32 %v1650_v44, %v594_v42 }
 0x14b   : > { %v1652_v45 = vpop.eup %1651 }
 0x14c   : > { %v610_v47 = vmul.f32 %v1652_v45, %v601_v43  ;;  %v605_v48 = vsel %vm604_vm2, %v594_v42, %v603_v46 }
 0x14d   : > { %1540 = vmatmul.mubr.msk.f32.gmra.mxu1 %vm506_vm1, %v644_v19  ;;  %v608_v53 = vsel %vm606_vm4, %v607_v49, %v605_v48 }
 0x14e   : > { %819 = vmatprep.mubr.f32.mxu1 %v2469_v0  ;;  %v612_v50 = vsel %vm611_vm3, %v601_v43, %v610_v47  ;;  %v616_v56 = vadd.f32 1e-05, %v608_v53 }
 0x14f   : > { %v615_v54 = vsel %vm613_vm5, %v614_v51, %v612_v50 }
 0x150   : > { %v617_v58 = vadd.f32 1e-05, %v615_v54  ;;  %1653 = vrcp.f32 %v616_v56 }
 0x151   : > { %1541 = vmatmul.mubr.msk.f32.gmra.mxu1 %vm506_vm1, %v645_v20 }
 0x152   : > { %825 = vmatprep.mubr.f32.mxu1 %v2469_v0  ;;  %1655 = vrcp.f32 %v617_v58 }
 0x155   : > { %1542 = vmatmul.mubr.msk.f32.gmra.mxu1 %vm506_vm1, %v646_v21 }
 0x156   : > { %831 = vmatprep.mubr.f32.mxu1 %v2469_v0 }
 0x159   : > { %1543 = vmatmul.mubr.msk.f32.gmra.mxu1 %vm506_vm1, %v647_v22 }
 0x15a   : > { %837 = vmatprep.mubr.f32.mxu1 %v2469_v0 }
 0x15d   : > { %1544 = vmatmul.mubr.msk.f32.gmra.mxu1 %vm506_vm1, %v648_v23  ;;  %v2139_v4 = vpop.eup %1653 }
 0x15e   : > { %843 = vmatprep.mubr.f32.mxu1 %v2469_v0 }
 0x15f   : > { %v2141_v5 = vpop.eup %1655 }
 0x161   : > { %1545 = vmatmul.mubr.msk.f32.gmra.mxu1 %vm506_vm1, %v649_v24 }
 0x162   : > { %849 = vmatprep.mubr.f32.mxu1 %v2469_v0 }
 0x165   : > { %1546 = vmatmul.mubr.msk.f32.gmra.mxu1 %vm506_vm1, %v650_v25 }
 0x166   : > { %855 = vmatprep.mubr.f32.mxu1 %v2469_v0 }
 0x169   : > { %1547 = vmatmul.mubr.msk.f32.gmra.mxu1 %vm506_vm1, %v651_v26 }
 0x16a   : > { %861 = vmatprep.mubr.f32.mxu1 %v2469_v0 }
 0x16d   : > { %1548 = vmatmul.mubr.msk.f32.gmra.mxu1 %vm506_vm1, %v652_v27 }
 0x1f1   : > { %v773_v52 = vpop.f32.mrf.mxu1 }
 0x1f2   : > { %v933_v9 = vmul.f32 %v2139_v4, %v773_v52 }
 0x1f3   : > { %v775_v55 = vpop.f32.mrf.mxu1 }
 0x1f4   : > { %v934_v11 = vmul.f32 %v2141_v5, %v775_v55  ;;  %v2154_v18 = vadd.f32 1.0, %v933_v9  ;;  %v1871_v55 = vmov 1  }
 0x1f5   : > { %v779_v57 = vpop.f32.mrf.mxu1  ;;  %1647 = vset.pattern.permute.xlu0 %v1871_v55 }
 0x1f6   : > { %v935_v6 = vmul.f32 %v2139_v4, %v779_v57  ;;  %v2157_v21 = vadd.f32 1.0, %v934_v11  ;;  %v2470_v31 = vmax.f32 %v2154_v18, 0.0 }
 0x1f7   : > { %v781_v59 = vpop.f32.mrf.mxu1 }
 0x1f8   : > { %v936_v8 = vmul.f32 %v2141_v5, %v781_v59  ;;  %v2148_v13 = vadd.f32 1.0, %v935_v6  ;;  %v2471_v35 = vmax.f32 %v2157_v21, 0.0  ;;  %v1271_v6 = vld [vmem:[%s494_s20] sm:$0xf] }
 0x1f9   : > { %v785_v60 = vpop.f32.mrf.mxu1  ;;  %1275 = vperm.xlu1 %1645, %v1271_v6  }
 0x1fa   : > { %v937_v12 = vmul.f32 %v2139_v4, %v785_v60  ;;  %v2151_v16 = vadd.f32 1.0, %v936_v8  ;;  %v2472_v24 = vmax.f32 %v2148_v13, 0.0 }
 0x1fb   : > { %v787_v61 = vpop.f32.mrf.mxu1 }
 0x1fc   : > { %v938_v14 = vmul.f32 %v2141_v5, %v787_v61  ;;  %v2159_v22 = vadd.f32 1.0, %v937_v12  ;;  %v2473_v28 = vmax.f32 %v2151_v16, 0.0  ;;  %v1029_v39 = vadd.f32 %v2472_v24, %v2470_v31 }
 0x1fd   : > { %v791_v62 = vpop.f32.mrf.mxu1  ;;  %1646 = vset.pattern.permute.xlu1 %v1871_v55 }
 0x1fe   : > { %v939_v17 = vmul.f32 %v2139_v4, %v791_v62  ;;  %v2163_v25 = vadd.f32 1.0, %v938_v14  ;;  %v2474_v36 = vmax.f32 %v2159_v22, 0.0  ;;  %v1050_v44 = vadd.f32 %v2473_v28, %v2471_v35  ;;  %1287 = vperm.xlu1 %1646, %v1271_v6  }
 0x1ff   : > { %v793_v63 = vpop.f32.mrf.mxu1 }
 0x200   : > { %v940_v19 = vmul.f32 %v2141_v5, %v793_v63  ;;  %v2167_v29 = vadd.f32 1.0, %v939_v17  ;;  %v2475_v40 = vmax.f32 %v2163_v25, 0.0  ;;  %v1030_v52 = vadd.f32 %v1029_v39, %v2474_v36 }
 0x201   : > { %v797_v1 = vpop.f32.mrf.mxu1 }
 0x202   : > { %v941_v23 = vmul.f32 %v2139_v4, %v797_v1  ;;  %v2171_v32 = vadd.f32 1.0, %v940_v19  ;;  %v2476_v45 = vmax.f32 %v2167_v29, 0.0  ;;  %v1051_v56 = vadd.f32 %v1050_v44, %v2475_v40 }
 0x203   : > { %v799_v2 = vpop.f32.mrf.mxu1 }
 0x204   : > { %v942_v26 = vmul.f32 %v2141_v5, %v799_v2  ;;  %v2176_v37 = vadd.f32 1.0, %v941_v23  ;;  %v2477_v48 = vmax.f32 %v2171_v32, 0.0  ;;  %v1031_v60 = vadd.f32 %v1030_v52, %v2476_v45 }
 0x205   : > { %v803_v3 = vpop.f32.mrf.mxu1 }
 0x206   : > { %v943_v30 = vmul.f32 %v2139_v4, %v803_v3  ;;  %v2184_v41 = vadd.f32 1.0, %v942_v26  ;;  %v2478_v53 = vmax.f32 %v2176_v37, 0.0  ;;  %v1052_v63 = vadd.f32 %v1051_v56, %v2477_v48 }
 0x207   : > { %v805_v7 = vpop.f32.mrf.mxu1 }
 0x208   : > { %v944_v33 = vmul.f32 %v2141_v5, %v805_v7  ;;  %v2193_v46 = vadd.f32 1.0, %v943_v30  ;;  %v2479_v57 = vmax.f32 %v2184_v41, 0.0  ;;  %v1032_v7 = vadd.f32 %v1031_v60, %v2478_v53 }
 0x209   : > { %v809_v10 = vpop.f32.mrf.mxu1 }
 0x20a   : > { %v945_v38 = vmul.f32 %v2139_v4, %v809_v10  ;;  %v2197_v49 = vadd.f32 1.0, %v944_v33  ;;  %v2480_v61 = vmax.f32 %v2193_v46, 0.0  ;;  %v1053_v9 = vadd.f32 %v1052_v63, %v2479_v57 }
 0x20b   : > { %v811_v15 = vpop.f32.mrf.mxu1 }
 0x20c   : > { %v946_v42 = vmul.f32 %v2141_v5, %v811_v15  ;;  %v2206_v54 = vadd.f32 1.0, %v945_v38  ;;  %v2481_v1 = vmax.f32 %v2197_v49, 0.0  ;;  %v1033_v12 = vadd.f32 %v1032_v7, %v2480_v61 }
 0x20d   : > { %v815_v20 = vpop.f32.mrf.mxu1 }
 0x20e   : > { %v947_v47 = vmul.f32 %v2139_v4, %v815_v20  ;;  %v2211_v58 = vadd.f32 1.0, %v946_v42  ;;  %v2482_v8 = vmax.f32 %v2206_v54, 0.0  ;;  %v1054_v17 = vadd.f32 %v1053_v9, %v2481_v1 }
 0x20f   : > { %v817_v27 = vpop.f32.mrf.mxu1 }
 0x210   : > { %v948_v50 = vmul.f32 %v2141_v5, %v817_v27  ;;  %v2217_v62 = vadd.f32 1.0, %v947_v47  ;;  %v2483_v10 = vmax.f32 %v2211_v58, 0.0  ;;  %v1034_v26 = vadd.f32 %v1033_v12, %v2482_v8 }
 0x211   : > { %v821_v34 = vpop.f32.mrf.mxu1 }
 0x212   : > { %v2227_v2 = vadd.f32 1.0, %v948_v50  ;;  %v1011_v14 = vmax.f32 %v2217_v62, 0.0  ;;  %v2239_v15 = vmul.f32 %v2139_v4, %v821_v34  ;;  %v1055_v30 = vadd.f32 %v1054_v17, %v2483_v10 }
 0x213   : > { %v823_v43 = vpop.f32.mrf.mxu1 }
 0x214   : > { %v1012_v19 = vmax.f32 %v2227_v2, 0.0  ;;  %v2245_v20 = vmul.f32 %v2141_v5, %v823_v43  ;;  %v1035_v38 = vadd.f32 %v1034_v26, %v1011_v14  ;;  %v1013_v39 = vmax.f32 %v2239_v15, 0.0 }
 0x215   : > { %v827_v51 = vpop.f32.mrf.mxu1  ;;  %v2508_v2 = vmax.f32 %v2193_v46, 0.0 }
 0x216   : > { %v2250_v27 = vmul.f32 %v2139_v4, %v827_v51  ;;  %v1056_v43 = vadd.f32 %v1055_v30, %v1012_v19  ;;  %v1014_v44 = vmax.f32 %v2245_v20, 0.0  ;;  %v1036_v60 = vadd.f32 %v1035_v38, %v1013_v39 }
 0x217   : > { %v829_v59 = vpop.f32.mrf.mxu1  ;;  %v2506_v20 = vmax.f32 %v2206_v54, 0.0 }
 0x218   : > { %v2255_v33 = vmul.f32 %v2141_v5, %v829_v59  ;;  %v1015_v51 = vmax.f32 %v2250_v27, 0.0  ;;  %v1057_v6 = vadd.f32 %v1056_v43, %v1014_v44 }
 0x219   : > { %v833_v3 = vpop.f32.mrf.mxu1 }
 0x21a   : > { %v2261_v42 = vmul.f32 %v2139_v4, %v833_v3  ;;  %v1016_v55 = vmax.f32 %v2255_v33, 0.0  ;;  %v2505_v33 = vmax.f32 %v2211_v58, 0.0  ;;  %v2510_v58 = vmax.f32 %v2176_v37, 0.0 }
 0x21b   : > { %v835_v11 = vpop.f32.mrf.mxu1 }
 0x21c   : > { %v2267_v47 = vmul.f32 %v2141_v5, %v835_v11  ;;  %v1017_v63 = vmax.f32 %v2261_v42, 0.0  ;;  %v1037_v11 = vadd.f32 %v1036_v60, %v1015_v51  ;;  %v1058_v26 = vadd.f32 %v1057_v6, %v1016_v55 }
 0x21d   : > { %v839_v23 = vpop.f32.mrf.mxu1 }
 0x21e   : > { %v2271_v52 = vmul.f32 %v2139_v4, %v839_v23  ;;  %v1018_v7 = vmax.f32 %v2267_v47, 0.0  ;;  %v1038_v38 = vadd.f32 %v1037_v11, %v1017_v63 }
 0x21f   : > { %v841_v34 = vpop.f32.mrf.mxu1 }
 0x220   : > { %v2275_v56 = vmul.f32 %v2141_v5, %v841_v34  ;;  %v1019_v12 = vmax.f32 %v2271_v52, 0.0  ;;  %v1059_v60 = vadd.f32 %v1058_v26, %v1018_v7 }
 0x221   : > { %v845_v50 = vpop.f32.mrf.mxu1 }
 0x222   : > { %v2281_v3 = vmul.f32 %v2139_v4, %v845_v50  ;;  %v1020_v30 = vmax.f32 %v2275_v56, 0.0 }
 0x223   : > { %v847_v59 = vpop.f32.mrf.mxu1 }
 0x224   : > { %v2290_v17 = vmul.f32 %v2141_v5, %v847_v59  ;;  %v1021_v43 = vmax.f32 %v2281_v3, 0.0  ;;  %v1060_v35 = vadd.f32 %v1059_v60, %v1020_v30 }
 0x225   : > { %v851_v9 = vpop.f32.mrf.mxu1 }
 0x226   : > { %v959_v23 = vmul.f32 %v2139_v4, %v851_v9  ;;  %v1039_v9 = vadd.f32 %v1038_v38, %v1019_v12  ;;  %v1022_v0 = vmax.f32 %v2290_v17, 0.0 }
 0x227   : > { %v853_v34 = vpop.f32.mrf.mxu1 }
 0x228   : > { %v960_v50 = vmul.f32 %v2141_v5, %v853_v34  ;;  %v1023_v6 = vmax.f32 %v959_v23, 0.0  ;;  %v1040_v24 = vadd.f32 %v1039_v9, %v1021_v43  ;;  %v1061_v26 = vadd.f32 %v1060_v35, %v1022_v0 }
 0x229   : > { %v857_v59 = vpop.f32.mrf.mxu1 }
 0x22a   : > { %v961_v31 = vmul.f32 %v2139_v4, %v857_v59  ;;  %v1024_v3 = vmax.f32 %v960_v50, 0.0  ;;  %v1041_v40 = vadd.f32 %v1040_v24, %v1023_v6 }
 0x22b   : > { %v859_v11 = vpop.f32.mrf.mxu1 }
 0x22c   : > { %v1025_v28 = vmax.f32 %v961_v31, 0.0  ;;  %v962_v34 = vmul.f32 %v2141_v5, %v859_v11  ;;  %v1062_v17 = vadd.f32 %v1061_v26, %v1024_v3 }
 0x22d   : > { %v863_v36 = vpop.f32.mrf.mxu1 }
 0x22e   : > { %v1026_v45 = vmax.f32 %v962_v34, 0.0  ;;  %v963_v38 = vmul.f32 %v2139_v4, %v863_v36  ;;  %v1042_v23 = vadd.f32 %v1041_v40, %v1025_v28 }
 0x22f   : > { %v865_v48 = vpop.f32.mrf.mxu1 }
 0x230   : > { %v1027_v53 = vmax.f32 %v963_v38, 0.0  ;;  %v964_v59 = vmul.f32 %v2141_v5, %v865_v48  ;;  %v1063_v57 = vadd.f32 %v1062_v17, %v1026_v45 }
 0x232   : > { %v1043_v60 = vadd.f32 %v1042_v23, %v1027_v53  ;;  %v1028_v61 = vmax.f32 %v964_v59, 0.0  ;;  %v2517_v59 = vmax.f32 %v2157_v21, 0.0 }
 0x234   : > { %v1044_v9 = vrot.slane %v1043_v60, 4  ;;  %v1064_v50 = vadd.f32 %v1063_v57, %v1028_v61 }
 0x236   : > { %v1045_v31 = vadd.f32 %v1044_v9, %v1043_v60  ;;  %v1065_v1 = vrot.slane %v1064_v50, 4  ;;  %v1107_v9 = vld [vmem:[%s2089_s26] sm:$0xf] }
 0x238   : > { %v1046_v11 = vrot.slane %v1045_v31, 2  ;;  %v1066_v8 = vadd.f32 %v1065_v1, %v1064_v50 }
 0x23a   : > { %v1047_v35 = vadd.f32 %v1046_v11, %v1045_v31  ;;  %v1067_v24 = vrot.slane %v1066_v8, 2  ;;  %v1872_v31 = vmov 839922192  }
 0x23b   : > { %v1278_v11 = vunpack.c.l.s4 %v1872_v31 }
 0x23c   : > { %v1048_v34 = vrot.slane %v1047_v35, 1  ;;  %v1068_v10 = vadd.f32 %v1067_v24, %v1066_v8 }
 0x23e   : > { %v1049_v4 = vadd.f32 %v1048_v34, %v1047_v35  ;;  %v1069_v36 = vrot.slane %v1068_v10, 1  ;;  %v1280_v35 = vlaneseq }
 0x240   : > { %v1071_v26 = vadd.f32 1e-05, %v1049_v4  ;;  %v1070_v40 = vadd.f32 %v1069_v36, %v1068_v10 }
 0x242   : > { %v1072_v38 = vadd.f32 1e-05, %v1070_v40  ;;  %1657 = vrcp.f32 %v1071_v26 }
 0x244   : > { %1659 = vrcp.f32 %v1072_v38  ;;  %v1279_v38 = vunpack.c.0.s8 %v1278_v11 }
 0x24f   : > { %v2311_v5 = vpop.eup %1657 }
 0x250   : > { %v2316_v57 = vmul.f32 %v2311_v5, %v1027_v53  ;;  %v2323_v8 = vmul.f32 %v2311_v5, %v1025_v28  ;;  %v1097_v28 = vmul.f32 %v2311_v5, %v1019_v12  ;;  %v1093_v52 = vmul.f32 %v2311_v5, %v1015_v51 }
 0x251   : > { %v1660_v48 = vpop.eup %1659  ;;  %v1091_v42 = vmul.f32 %v2311_v5, %v1013_v39  ;;  %v1089_v27 = vmul.f32 %v2311_v5, %v1011_v14  ;;  %v1087_v15 = vmul.f32 %v2311_v5, %v2506_v20  ;;  %v2507_v39 = vmax.f32 %v2197_v49, 0.0 }
 0x252   : > { %v2313_v17 = vmul.f32 %v1660_v48, %v1028_v61  ;;  %v2319_v1 = vmul.f32 %v1660_v48, %v1026_v45  ;;  %v2326_v10 = vmul.f32 %v1660_v48, %v1024_v3  ;;  %v1101_v61 = vmul.f32 %v2311_v5, %v1023_v6 }
 0x253   : > { %v1100_v53 = vmul.f32 %v1660_v48, %v1022_v0  ;;  %v1099_v45 = vmul.f32 %v2311_v5, %v1021_v43  ;;  %v1098_v23 = vmul.f32 %v1660_v48, %v1020_v30  ;;  %v1096_v3 = vmul.f32 %v1660_v48, %v1018_v7 }
 0x254   : > { %1108 = vmatprep.subr.mxu0 %v2313_v17  ;;  %v1095_v0 = vmul.f32 %v2311_v5, %v1017_v63  ;;  %v1094_v43 = vmul.f32 %v1660_v48, %v1016_v55  ;;  %v1092_v56 = vmul.f32 %v1660_v48, %v1014_v44  ;;  %v1090_v47 = vmul.f32 %v1660_v48, %v1012_v19 }
 0x255   : > { %1109 = vmatpush1.msra.mxu0 %v2316_v57  ;;  %v1088_v51 = vmul.f32 %v1660_v48, %v2505_v33  ;;  %v1086_v44 = vmul.f32 %v1660_v48, %v2507_v39  ;;  %v1085_v62 = vmul.f32 %v2311_v5, %v2508_v2  ;;  %v2509_v14 = vmax.f32 %v2184_v41, 0.0 }
 0x256   : > { %1110 = vmatprep.subr.mxu0 %v2319_v1  ;;  %v1083_v54 = vmul.f32 %v2311_v5, %v2510_v58  ;;  %v2511_v55 = vmax.f32 %v2171_v32, 0.0  ;;  %v2512_v63 = vmax.f32 %v2167_v29, 0.0  ;;  %v2513_v7 = vmax.f32 %v2163_v25, 0.0 }
 0x257   : > { %1111 = vmatpush1.msra.mxu0 %v2323_v8  ;;  %v1084_v19 = vmul.f32 %v1660_v48, %v2509_v14  ;;  %v2514_v12 = vmax.f32 %v2159_v22, 0.0  ;;  %v2515_v30 = vmax.f32 %v2151_v16, 0.0  ;;  %v2516_v6 = vmax.f32 %v2148_v13, 0.0  ;;  %v1179_v16 = vld [vmem:[%s490_s23] sm:$0xf] }
 0x258   : > { %1112 = vmatprep.subr.mxu0 %v2326_v10  ;;  %v1082_v49 = vmul.f32 %v1660_v48, %v2511_v55  ;;  %v1081_v46 = vmul.f32 %v2311_v5, %v2512_v63  ;;  %v1080_v41 = vmul.f32 %v1660_v48, %v2513_v7  ;;  %v1076_v60 = vmul.f32 %v1660_v48, %v2517_v59 }
 0x259   : > { %1113 = vmatpush1.msra.mxu0 %v1101_v61  ;;  %v1079_v37 = vmul.f32 %v2311_v5, %v2514_v12  ;;  %v1078_v32 = vmul.f32 %v1660_v48, %v2515_v30  ;;  %v1077_v29 = vmul.f32 %v2311_v5, %v2516_v6  ;;  %v2518_v25 = vmax.f32 %v2154_v18, 0.0 }
 0x25a   : > { %1114 = vmatprep.subr.mxu0 %v1100_v53  ;;  %v2519_v13 = vmov 0.0  }
 0x25b   : > { %1115 = vmatpush1.msra.mxu0 %v1099_v45  ;;  %v1075_v22 = vmul.f32 %v2311_v5, %v2518_v25  ;;  %v1281_v5 = vshrl.u32 %v1280_v35, 7 }
 0x25c   : > { %1116 = vmatprep.subr.mxu0 %v1098_v23 }
 0x25d   : > { %1117 = vmatpush1.msra.mxu0 %v1097_v28 }
 0x25e   : > { %1118 = vmatprep.subr.mxu0 %v1096_v3 }
 0x25f   : > { %1119 = vmatpush1.msra.mxu0 %v1095_v0 }
 0x260   : > { %1120 = vmatprep.subr.mxu0 %v1094_v43 }
 0x261   : > { %1121 = vmatpush1.msra.mxu0 %v1093_v52 }
 0x262   : > { %1122 = vmatprep.subr.mxu0 %v1092_v56 }
 0x263   : > { %1123 = vmatpush1.msra.mxu0 %v1091_v42 }
 0x264   : > { %1124 = vmatprep.subr.mxu0 %v1090_v47 }
 0x265   : > { %1125 = vmatpush1.msra.mxu0 %v1089_v27 }
 0x266   : > { %1126 = vmatprep.subr.mxu0 %v1088_v51 }
 0x267   : > { %1127 = vmatpush1.msra.mxu0 %v1087_v15 }
 0x268   : > { %1128 = vmatprep.subr.mxu0 %v1086_v44 }
 0x269   : > { %1129 = vmatpush1.msra.mxu0 %v1085_v62 }
 0x26a   : > { %1130 = vmatprep.subr.mxu0 %v1084_v19 }
 0x26b   : > { %1131 = vmatpush1.msra.mxu0 %v1083_v54 }
 0x26c   : > { %1132 = vmatprep.subr.mxu0 %v1082_v49 }
 0x26d   : > { %1133 = vmatpush1.msra.mxu0 %v1081_v46 }
 0x26e   : > { %1134 = vmatprep.subr.mxu0 %v1080_v41 }
 0x26f   : > { %1135 = vmatpush1.msra.mxu0 %v1079_v37 }
 0x270   : > { %1136 = vmatprep.subr.mxu0 %v1078_v32 }
 0x271   : > { %1137 = vmatpush1.msra.mxu0 %v1077_v29 }
 0x272   : > { %1138 = vmatprep.subr.mxu0 %v1076_v60 }
 0x273   : > { %1139 = vmatpush1.msra.mxu0 %v1075_v22 }
 0x274   : > { %1173 = vmatmul.mubr.f32.vlgmr.msra.gmra.mxu0 %v1107_v9  ;;  %1180 = vmatprep.subr.mxu0 %v2313_v17  ;;  %v1276_v17 = vpop.permute.xlu1 %1275 }
 0x275   : > { %1181 = vmatpush1.msra.mxu0 %v2316_v57  ;;  %1244 = vmatprep.mubr.f32.mxu0 %v2519_v13  ;;  %v1282_v57 = vsub.s32 %v1279_v38, %v1281_v5 }
 0x276   : > { %1182 = vmatprep.subr.mxu0 %v2319_v1 }
 0x277   : > { %1183 = vmatpush1.msra.mxu0 %v2323_v8  ;;  %v1283_v1 = vrot.slane %v1276_v17, %v1282_v57  ;;  %v1272_v8 = vld [vmem:[%s484_s15] sm:$0xff] }
 0x278   : > { %1184 = vmatprep.subr.mxu0 %v2326_v10 }
 0x279   : > { %1185 = vmatpush1.msra.mxu0 %v1101_v61  ;;  %v1288_v10 = vpop.permute.xlu1 %1287  ;;  %v1285_v61 = vsub.f32 %v1272_v8, %v1283_v1 }
 0x27a   : > { %1186 = vmatprep.subr.mxu0 %v1100_v53  ;;  %v1295_v53 = vrot.slane %v1288_v10, %v1282_v57 }
 0x27b   : > { %1187 = vmatpush1.msra.mxu0 %v1099_v45 }
 0x27c   : > { %1188 = vmatprep.subr.mxu0 %v1098_v23 }
 0x27d   : > { %1189 = vmatpush1.msra.mxu0 %v1097_v28  ;;  %v1297_v28 = vmul.f32 %v1295_v53, %v1285_v61 }
 0x27e   : > { %1190 = vmatprep.subr.mxu0 %v1096_v3 }
 0x27f   : > { %1191 = vmatpush1.msra.mxu0 %v1095_v0 }
 0x280   : > { %1192 = vmatprep.subr.mxu0 %v1094_v43 }
 0x281   : > { %1193 = vmatpush1.msra.mxu0 %v1093_v52 }
 0x282   : > { %1194 = vmatprep.subr.mxu0 %v1092_v56 }
 0x283   : > { %1195 = vmatpush1.msra.mxu0 %v1091_v42 }
 0x284   : > { %1196 = vmatprep.subr.mxu0 %v1090_v47 }
 0x285   : > { %1197 = vmatpush1.msra.mxu0 %v1089_v27  ;;  %v1299_v27 = vcombine.high %v1297_v28, %v1297_v28 }
 0x286   : > { %1198 = vmatprep.subr.mxu0 %v1088_v51 }
 0x287   : > { %1199 = vmatpush1.msra.mxu0 %v1087_v15 }
 0x288   : > { %1200 = vmatprep.subr.mxu0 %v1086_v44 }
 0x289   : > { %1201 = vmatpush1.msra.mxu0 %v1085_v62 }
 0x28a   : > { %1202 = vmatprep.subr.mxu0 %v1084_v19 }
 0x28b   : > { %1203 = vmatpush1.msra.mxu0 %v1083_v54 }
 0x28c   : > { %1204 = vmatprep.subr.mxu0 %v1082_v49 }
 0x28d   : > { %1205 = vmatpush1.msra.mxu0 %v1081_v46 }
 0x28e   : > { %1206 = vmatprep.subr.mxu0 %v1080_v41 }
 0x28f   : > { %1207 = vmatpush1.msra.mxu0 %v1079_v37 }
 0x290   : > { %1208 = vmatprep.subr.mxu0 %v1078_v32 }
 0x291   : > { %1209 = vmatpush1.msra.mxu0 %v1077_v29 }
 0x292   : > { %1210 = vmatprep.subr.mxu0 %v1076_v60 }
 0x293   : > { %1211 = vmatpush1.msra.mxu0 %v1075_v22 }
 0x294   : > { %1245 = vmatmul.mubr.f32.vlgmr.msra.gmra.mxu0 %v1179_v16 }
 0x334   : > { %v1174_v18 = vpop.f32.mrf.mxu0 }
 0x335   : > { %v1251_v50 = vmul.f32 %v1174_v18, %v1174_v18 }
 0x336   : > { %v1176_v21 = vpop.f32.mrf.mxu0 }
 0x337   : > { %v1252_v34 = vmul.f32 %v1176_v21, %v1176_v21 }
 0x354   : > { %v1246_v24 = vpop.f32.mrf.mxu0 }
 0x355   : > { %v1253_v4 = vsub.f32 %v1246_v24, %v1251_v50 }
 0x356   : > { %v1248_v36 = vpop.f32.mrf.mxu0 }
 0x357   : > { %v1255_v26 = vmax.f32 %v1253_v4, 0.0  ;;  %v1254_v40 = vsub.f32 %v1248_v36, %v1252_v34 }
 0x359   : > { %1661 = vrsqrt.f32 %v1255_v26  ;;  %v1256_v48 = vmax.f32 %v1254_v40, 0.0  ;;  %vm1259_vm6 = vcmp.eq.f32.partialorder %v1255_v26, inf  ;;  %v1262_v0 = vand.u32 2147483648, %v1255_v26 }
 0x35a   : > { %vm1261_vm7 = vcmp.eq.f32.partialorder %v1255_v26, 0.0 }
 0x35b   : > { %1663 = vrsqrt.f32 %v1256_v48  ;;  %vm1266_vm8 = vcmp.eq.f32.partialorder %v1256_v48, inf  ;;  %v1269_v42 = vand.u32 2147483648, %v1256_v48  ;;  %vm1268_vm9 = vcmp.eq.f32.partialorder %v1256_v48, 0.0 }
 0x366   : > { %v1662_v45 = vpop.eup %1661 }
 0x367   : > { %v1258_v23 = vmul.f32 %v1662_v45, %v1255_v26 }
 0x368   : > { %v1664_v3 = vpop.eup %1663 }
 0x369   : > { %v1260_v43 = vsel %vm1259_vm6, %v1255_v26, %v1258_v23  ;;  %v1265_v52 = vmul.f32 %v1664_v3, %v1256_v48 }
 0x36a   : > { %v1263_v56 = vsel %vm1261_vm7, %v1262_v0, %v1260_v43 }
 0x36b   : > { %v1267_v47 = vsel %vm1266_vm8, %v1256_v48, %v1265_v52  ;;  %v1301_v33 = vmul.f32 %v1297_v28, %v1263_v56 }
 0x36c   : > { %v1270_v51 = vsel %vm1268_vm9, %v1269_v42, %v1267_v47 }
 0x36d   : > { %v1302_v20 = vmul.f32 %v1299_v27, %v1270_v51  ;;  %v1303_v15 = vadd.f32 %v1301_v33, %v1174_v18 }
 0x36f   : > { %v1304_v39 = vadd.f32 %v1302_v20, %v1176_v21 }
 0x371   : > { %v1307_v44 = vcombine.low %v1303_v15, %v1304_v39 }
 0x373   : > { %1309 = vst [vmem:[%s475_s21] sm:$0xff] %v1307_v44 }
 0x374   : > { %1788 = shalt.err (!%p1785_p0)
}
 0x375   : > { %s1789_s9 = scalar_lea.hbm %s1325_s10, 128  ;;  %s1793_s14 = scalar_lea.hbm %s2458_s8, 256 }
 0x376   : > { %p1790_p4 = scmp.ne.s32.totalorder %s1325_s10, %s1789_s9  ;;  %p1794_p7 = scmp.lt.s32.totalorder %s1325_s10, %s2458_s8 }
 0x377   : > { %p1795_p2 = scmp.lt.s32.totalorder %s1793_s14, %s1789_s9 }
 0x378   : > { %p1791_p3 = pnand %p1790_p4, %p2520_p6 }
 0x379   : > { %p1796_p11 = por %p1795_p2, %p1794_p7 }
 0x37a   : > { %p1792_p8 = pneg %p1791_p3 }
 0x37c   : > { %p1797_p5 = pnand %p1796_p11, %p1792_p8 }
 0x37e   : > { %1800 = shalt.err (!%p1797_p5)
}
 0x37f   : > { %1567 = dma.vmem_to_hbm [thread:$0]  (%p2520_p6), %s1328_s24, 128, %s1325_s10, %s1311_s11  }
 0x380 PF: > { %s2521_s2 = sld [smem:[#allocation20_spill]]  ;;  %s1339_s17 = sand.u32 1, %s1843_s27  }
 0x381   : > { %s2522_s12 = sld [smem:[#allocation17_spill]]  ;;  %s1340_s15 = scalar_lea.sflag [#allocation4], %s1339_s17 }
 0x386   : > { %p2523_p9 = scmp.ne.s32.totalorder %s2521_s2, 0 }
 0x387   : > { %p2524_p12 = scmp.ge.s32.totalorder %s2522_s12, 2 }
 0x389   : > { %p1584_p13 = pnand %p2524_p12, %p2523_p9 }
 0x38b   : > { %p1585_p1 = pneg %p1584_p13 }
 0x38d   : > { %1838 = dma.done.wait (%p1585_p1), %s1340_s15, 128  }
 0x38e   : > { %1840 = vsyncadd (%p1585_p1), %s1340_s15, 4294967168  ;;  %s28_s10 = sadd.s32 1, %s2522_s12   ;;  %s2525_s25 = sld [smem:[#allocation15_spill]] }
 0x38f   : > { %p25_p10 = scmp.ge.s32.totalorder %s28_s10, 4   ;;  %s2526_s29 = sld [smem:[#allocation19_spill]] }
 0x390   : > { %s2527_s30 = sld [smem:[#allocation16_spill]]  ;;  %s2529_s27 = smov %s1847_s28 }
 0x391   : > { %s2528_s9 = sld [smem:[#allocation18_spill]]  ;;  %27 = sbr.rel (!%p25_p10) target bundleno = 12 (0xc), region = 134 }
 0x394   : > { %s2530_s28 = smov %s2525_s25 }
 0x396   :  { %1345 = vsyncpa [#allocation3], 1 }
 0x397   :  { %1347 = vsyncpa [#allocation3 + $0x1], 1 }
 0x398   :  { %1348 = vsyncpa [#allocation6], 1 }
 0x399   :  { %1350 = vsyncpa [#allocation6 + $0x1], 1 }
 0x39a   :  { %1351 = vsyncpa [#allocation9], 1 }
 0x39b   :  { %1352 = vsyncpa [#allocation4], 1 }
 0x39c   :  { %1354 = vsyncpa [#allocation4 + $0x1], 1 }

</bundles_post_ra>
